<compile_context>
chip_gen: v5e
topology: v5e:2x2
jax: 0.10.0
libtpu: 0.0.40
codegen_flags: <defaults>
</compile_context>

<pallas_src>
import jax
import jax.numpy as jnp
from jax.experimental import pallas as pl
from jax.experimental.pallas import tpu as pltpu


def _scaling_kernel(shift_ref, inv_ref, x_ref, o_ref):
    # shift_ref / inv_ref: (row_tile, 1) f32 VMEM, broadcast across lanes.
    # x_ref / o_ref:       (row_tile, lane) f32 VMEM, lane- and sublane-dense.
    # Two VPU ops per vreg; the HBM stream is the bottleneck, not compute.
    o_ref[...] = (x_ref[...] - shift_ref[...]) * inv_ref[...]


def _pick_lane(s_pad):
    # Largest multiple of 128 (capped at 512) dividing the padded spatial size,
    # so the block's last dim is lane-dense (unmasked vst).
    for cand in (512, 384, 256, 128):
        if s_pad % cand == 0:
            return cand
    raise AssertionError("s_pad is always a multiple of 128")


def _pick_row_tile(total_rows, lane):
    # ~2 MiB of f32 per input block => ~8 MiB for the double-buffered in+out
    # pipeline, comfortably under every generation's scoped-VMEM default.
    budget = max(8, ((2 * 1024 * 1024 // 4) // lane) // 8 * 8)
    # Keep >= ~4 grid steps (when the tensor allows it) so both v7x
    # TensorCores get work; never drop below 8 sublanes per block.
    per_step = (total_rows // 4) // 8 * 8
    if per_step >= 8:
        budget = min(budget, per_step)
    if total_rows <= budget:
        return total_rows          # full extent: always legal
    return budget                  # multiple of 8: sublane-dense

    # TODO(synk): optionally sweep pipeline_mode=pl.Buffered(3) on the x spec
    # for v7x once blocks are this size (neutral on v5e/v6e).


def scaling_layer(x, shift, scale):
    """Pallas implementation of ScalingLayer.forward: (x - shift) / scale.

    x:     (N, C, H, W) float32
    shift: (C,) float32
    scale: (C,) float32
    """
    N, C, H, W = x.shape
    S = H * W

    # Pad the flattened spatial dim to a multiple of 128 so the kernel only
    # ever sees lane-dense tiles; the pad is sliced off after the call.
    S_pad = ((S + 127) // 128) * 128
    lane = _pick_lane(S_pad)
    rows = S_pad // lane            # rows per (n, c) image
    R = N * C * rows                # total rows in the 2-D view

    x3 = x.reshape(N, C, S)
    if S_pad != S:
        x3 = jnp.pad(x3, ((0, 0), (0, 0), (0, S_pad - S)))
    x2 = x3.reshape(R, lane)        # contiguous reshape: layout plumbing only

    # Per-row constants: row r belongs to channel (r // rows) % C.
    # Exact f32 reciprocal computed once outside the hot path; the kernel's
    # (x - shift) * inv matches (x - shift) / scale to within ~1 ulp.
    shift_rows = jnp.repeat(jnp.tile(shift.astype(x.dtype), N), rows)[:, None]
    inv_rows = jnp.repeat(jnp.tile((1.0 / scale).astype(x.dtype), N), rows)[:, None]

    row_tile = _pick_row_tile(R, lane)
    grid = (pl.cdiv(R, row_tile),)

    out2 = pl.pallas_call(
        _scaling_kernel,
        out_shape=jax.ShapeDtypeStruct((R, lane), x.dtype),
        grid=grid,
        in_specs=[
            pl.BlockSpec((row_tile, 1), lambda i: (i, 0)),
            pl.BlockSpec((row_tile, 1), lambda i: (i, 0)),
            pl.BlockSpec((row_tile, lane), lambda i: (i, 0)),
        ],
        out_specs=pl.BlockSpec((row_tile, lane), lambda i: (i, 0)),
        compiler_params=pltpu.CompilerParams(
            dimension_semantics=("parallel",),
        ),
    )(shift_rows, inv_rows, x2)

    out3 = out2.reshape(N, C, S_pad)
    if S_pad != S:
        out3 = out3[:, :, :S]
    return out3.reshape(N, C, H, W)


if __name__ == "__main__":
    # Deterministic parameters (match the PyTorch buffers exactly).
    shift = jnp.array([-0.030, -0.088, -0.188], dtype=jnp.float32)
    scale = jnp.array([0.458, 0.448, 0.450], dtype=jnp.float32)

    # Small deterministic input: batch=2, channels=3 (fixed by the module), 16x16 spatial.
    key = jax.random.PRNGKey(0)
    x = jax.random.normal(key, (2, 3, 16, 16), dtype=jnp.float32)

    out = scaling_layer(x, shift, scale)
    out = jax.block_until_ready(out)

    # Reference check against plain-JAX semantics of the PyTorch forward.
    expected = (x - shift[None, :, None, None]) / scale[None, :, None, None]
    assert out.shape == expected.shape and out.dtype == expected.dtype
    assert jnp.allclose(out, expected, rtol=1e-6, atol=1e-6)

    print("KERNEL_OK")
</pallas_src>

<mosaic_0001>
module attributes {stable_mosaic.version = 11 : i64} {
  func.func @_scaling_kernel(%arg0: i32, %arg1: memref<6x1xf32, #tpu.memory_space<vmem>>, %arg2: memref<6x1xf32, #tpu.memory_space<vmem>>, %arg3: memref<6x256xf32, #tpu.memory_space<vmem>>, %arg4: memref<6x256xf32, #tpu.memory_space<vmem>>) attributes {dimension_semantics = [#tpu.dimension_semantics<parallel>], iteration_bounds = array<i64: 1>, scalar_prefetch = 0 : i64, scratch_operands = 0 : i64, tpu.core_type = #tpu.core_type<tc>, window_params = [{transform_indices = @transform_0, window_bounds = array<i64: 6, 1>}, {transform_indices = @transform_1, window_bounds = array<i64: 6, 1>}, {transform_indices = @transform_2, window_bounds = array<i64: 6, 256>}, {transform_indices = @transform_3, window_bounds = array<i64: 6, 256>}]} {
    %c0 = arith.constant 0 : index
    %c0_0 = arith.constant 0 : index
    %0 = vector.load %arg3[%c0, %c0_0] : memref<6x256xf32, #tpu.memory_space<vmem>>, vector<6x256xf32>
    %c0_1 = arith.constant 0 : index
    %c0_2 = arith.constant 0 : index
    %1 = vector.load %arg1[%c0_1, %c0_2] : memref<6x1xf32, #tpu.memory_space<vmem>>, vector<6x1xf32>
    %2 = vector.broadcast %1 : vector<6x1xf32> to vector<6x256xf32>
    %3 = arith.subf %0, %2 : vector<6x256xf32>
    %c0_3 = arith.constant 0 : index
    %c0_4 = arith.constant 0 : index
    %4 = vector.load %arg2[%c0_3, %c0_4] : memref<6x1xf32, #tpu.memory_space<vmem>>, vector<6x1xf32>
    %5 = vector.broadcast %4 : vector<6x1xf32> to vector<6x256xf32>
    %6 = arith.mulf %3, %5 : vector<6x256xf32>
    %c0_5 = arith.constant 0 : index
    %c0_6 = arith.constant 0 : index
    %7 = vector.load %arg4[%c0_5, %c0_6] : memref<6x256xf32, #tpu.memory_space<vmem>>, vector<6x256xf32>
    tpu.vector_store %arg4[%c0_5, %c0_6], %6 {strides = array<i32>} : memref<6x256xf32, #tpu.memory_space<vmem>>, vector<6x256xf32>,
    return
  }
  func.func @transform_0(%arg0: i32) -> (i32, i32) {
    %c0_i32 = arith.constant 0 : i32
    %c0_i32_0 = arith.constant 0 : i32
    return %arg0, %c0_i32 : i32, i32
  }
  func.func @transform_1(%arg0: i32) -> (i32, i32) {
    %c0_i32 = arith.constant 0 : i32
    %c0_i32_0 = arith.constant 0 : i32
    return %arg0, %c0_i32 : i32, i32
  }
  func.func @transform_2(%arg0: i32) -> (i32, i32) {
    %c0_i32 = arith.constant 0 : i32
    %c0_i32_0 = arith.constant 0 : i32
    return %arg0, %c0_i32 : i32, i32
  }
  func.func @transform_3(%arg0: i32) -> (i32, i32) {
    %c0_i32 = arith.constant 0 : i32
    %c0_i32_0 = arith.constant 0 : i32
    return %arg0, %c0_i32 : i32, i32
  }
}

</mosaic_0001>

<bundles_post_ra>
// kernel: tpu_custom_call.1
= control target key start
LH: loop header
LB: loop body
LE: loop exit
PB: predicated region body
PF: predicated region fallthrough
CT: control target
= control target key end

     0   :  { %v80_v1 = vmov 0   ;;  %s117_s0 = inlined_call_operand.vmem [shape: f32[6,1], index: 0, kind: input, shape index: {}]   ;;  %s118_s1 = inlined_call_operand.vmem [shape: f32[6,1], index: 1, kind: input, shape index: {}]   ;;  %s119_s2 = inlined_call_operand.vmem [shape: f32[6,256], index: 2, kind: input, shape index: {}]   ;;  %s120_s3 = inlined_call_operand.hbm [shape: f32[6,256], index: 3, kind: output, shape index: {}]  }
   0x1   :  { %v17_v0 = vld [vmem:[%s117_s0] sm:$0x3f]  ;;  %53 = vset.pattern.permute.xlu0 %v80_v1 }
   0x2   :  { %8 = vsyncpa [#allocation3], 0  ;;  %20 = vperm.xlu0 %53, %v17_v0   ;;  %v25_v2 = vld [vmem:[%s118_s1] sm:$0x3f]  ;;  %v16_v5 = vld [vmem:[%s119_s2 + $0x8] sm:$0x3f] }
   0x3   :  { %v15_v4 = vld [vmem:[%s119_s2] sm:$0x3f]  ;;  %s81_s0 = smov [#allocation2]   ;;  %s42_s23 = sshll.u32 %s120_s3, 4  ;;  %s43_s23 = int_to_ptr.hbm [resolvable:$true] %s42_s23 }
   0x4   :  { %s40_s20 = sshll.u32 %s81_s0, 4  ;;  %s41_s20 = int_to_ptr.vmem [resolvable:$true] %s40_s20 }
   0xa   :  { %28 = vperm.xlu0 %53, %v25_v2  }
  0x74   :  { %v21_v3 = vpop.permute.xlu0 %20 }
  0x75   :  { %v23_v6 = vsub.f32 %v15_v4, %v21_v3  ;;  %v24_v7 = vsub.f32 %v16_v5, %v21_v3 }
  0x7c   :  { %v29_v8 = vpop.permute.xlu0 %28 }
  0x7d   :  { %v31_v9 = vmul.f32 %v29_v8, %v23_v6  ;;  %v32_v10 = vmul.f32 %v29_v8, %v24_v7 }
  0x7f   :  { %33 = vst [vmem:[#allocation2] sm:$0x3f] %v31_v9 }
  0x80   :  { %34 = vst [vmem:[#allocation2 + $0x8] sm:$0x3f] %v32_v10 }
  0x81   :  { %45 = dma.vmem_to_hbm [thread:$0]  %s41_s20, 256, %s43_s23, [#allocation3]  }
  0x82   :  { %78 = dma.done.wait [#allocation3], 256  }
  0x83   :  { %79 = vsyncadd [#allocation3], 4294967040 }
  0x84   :  { %50 = vsyncpa [#allocation3], 1 }

</bundles_post_ra>
